<compile_context>
chip_gen: v6e
topology: v6e:2x2x1
jax: 0.10.0
libtpu: 0.0.40
codegen_flags: <defaults>
</compile_context>

<pallas_src>
import jax
import jax.numpy as jnp
from jax import lax
from jax.experimental import pallas as pl
from jax.experimental.pallas import tpu as pltpu

# ----- hyper-parameters (mirror the PyTorch script) -----
BLOCK_SIZE = 8                       # T, max sequence length
N_EMBD = 32                          # C
NUM_HEADS = 4
HEAD_SIZE = N_EMBD // NUM_HEADS      # 8
BATCH = 2                            # example batch size B
LANE = 128                           # TPU lane width; logits padded to this

DATASET = "the quick brown fox jumps over the lazy dog"
CHARS = sorted(set(DATASET))
VOCAB_SIZE = len(CHARS)              # 27
V_PAD = ((VOCAB_SIZE + 7) // 8) * 8  # 32 (so NUM_HEADS*V_PAD == 128 == LANE)

BT = BATCH * BLOCK_SIZE              # 16 rows of the final logits
STACK = NUM_HEADS * BT               # 64 stacked rows, ordered (head, batch, time)

# ----- packed constant-slab row offsets (all blocks zero-padded to 128 lanes) -----
OFF_TAUG = 0                               # (NUM_HEADS*V_PAD, 3*HEAD_SIZE) token->qkv
OFF_POS = OFF_TAUG + NUM_HEADS * V_PAD     # (STACK, 3*HEAD_SIZE) pre-tiled pos->qkv
OFF_MASK = OFF_POS + STACK                 # (STACK, STACK) additive 0/-inf bias
OFF_WLM = OFF_MASK + STACK                 # (N_EMBD, LANE) lm_head weight (padded)
OFF_BLM = OFF_WLM + N_EMBD                 # (1, LANE)     lm_head bias   (padded)
SLAB_ROWS = ((OFF_BLM + 1 + 7) // 8) * 8   # 296


def _bigram_fwd_kernel(idx_ref, slab_ref, o_ref):
    # idx_ref : (STACK, 1) int32   stacked ids: row (h,b,t) holds h*V_PAD + idx[b,t]
    # slab_ref: (SLAB_ROWS, 128)   packed constants (see offsets above)
    # o_ref   : (BT, 128) f32      padded logits (single lane-dense store)
    NH, HS = NUM_HEADS, HEAD_SIZE

    # ---- stacked one-hot over (head, vocab): exactly one vreg lane-width ----
    ids = idx_ref[...]                                                  # (STACK, 1)
    one_hot = (lax.broadcasted_iota(jnp.int32, (STACK, NH * V_PAD), 1)
               == ids).astype(jnp.float32)                             # (STACK, 128)

    # ---- static slices of the packed constant slab (free) ----
    t_aug = slab_ref[OFF_TAUG:OFF_TAUG + NH * V_PAD, :][:, :3 * HS]    # (128, 24)
    pos_s = slab_ref[OFF_POS:OFF_POS + STACK, :][:, :3 * HS]           # (64, 24)
    bias = slab_ref[OFF_MASK:OFF_MASK + STACK, :][:, :STACK]           # (64, 64)
    w_lm = slab_ref[OFF_WLM:OFF_WLM + N_EMBD, :]                       # (32, 128)
    b_lm = slab_ref[OFF_BLM:OFF_BLM + 1, :]                            # (1, 128)

    # ---- embeddings + position + QKV projection: ONE matmul, already stacked ----
    qkv = jnp.dot(one_hot, t_aug, preferred_element_type=jnp.float32) + pos_s
    q = qkv[:, 0:HS]                                                   # (STACK, HS)
    k = qkv[:, HS:2 * HS]
    v = qkv[:, 2 * HS:3 * HS]

    # ---- block-diagonal batched attention: ONE score matmul for all (b,h) ----
    s = lax.dot_general(q, k, (((1,), (1,)), ((), ())),
                        preferred_element_type=jnp.float32)            # (STACK, STACK)
    s = s + bias   # 0 on own causal (b,h) block, -inf elsewhere (no 1/sqrt(hs))

    # F.softmax(wei, dim=1) == softmax over the *query* axis == rows here.
    s = s - jnp.max(s, axis=0, keepdims=True)
    e = jnp.exp(s)
    inv = pl.reciprocal(jnp.sum(e, axis=0, keepdims=True), approx=False)
    wei = e * inv

    att_s = jnp.dot(wei, v, preferred_element_type=jnp.float32)        # (STACK, HS)

    # (head-major row blocks) -> head-concatenated (BT, C)
    att = jnp.concatenate(
        [att_s[h * BT:(h + 1) * BT, :] for h in range(NH)], axis=1)    # (BT, C)

    # ---- lm_head into lane-dense padded logits; single full-width store ----
    logits = jnp.dot(att, w_lm, preferred_element_type=jnp.float32) + b_lm
    o_ref[...] = logits.astype(o_ref.dtype)


def pack_params(tok_tab, pos_tab, wq, wk, wv, w_lm, b_lm):
    """Fold embedding tables into the QKV weights and pack every constant into
    one lane-dense (SLAB_ROWS, 128) f32 slab (single DMA into the kernel)."""
    C = N_EMBD
    tok_pad = jnp.zeros((V_PAD, C), jnp.float32).at[:VOCAB_SIZE].set(tok_tab)

    t_aug_blocks, pos_blocks = [], []
    for h in range(NUM_HEADS):
        cs = slice(h * HEAD_SIZE, (h + 1) * HEAD_SIZE)
        w_h = jnp.concatenate([wq[:, cs], wk[:, cs], wv[:, cs]], axis=1)  # (C, 24)
        t_aug_blocks.append(tok_pad @ w_h)                                # (V_PAD, 24)
        pos_blocks.append(jnp.tile(pos_tab @ w_h, (BATCH, 1)))            # (BT, 24)
    t_aug = jnp.concatenate(t_aug_blocks, axis=0)                         # (128, 24)
    pos_s = jnp.concatenate(pos_blocks, axis=0)                           # (64, 24)

    # additive mask: 0 inside each (head,batch) causal block, -inf elsewhere
    r = jnp.arange(STACK)
    same_block = (r[:, None] // BLOCK_SIZE) == (r[None, :] // BLOCK_SIZE)
    causal = (r[None, :] % BLOCK_SIZE) <= (r[:, None] % BLOCK_SIZE)  # key_t <= query_t
    bias = jnp.where(same_block & causal, 0.0, -jnp.inf).astype(jnp.float32)

    w_lm_pad = jnp.zeros((N_EMBD, LANE), jnp.float32).at[:, :VOCAB_SIZE].set(w_lm)
    b_lm_pad = jnp.zeros((1, LANE), jnp.float32).at[0, :VOCAB_SIZE].set(b_lm)

    def pad_lanes(a):
        return jnp.zeros((a.shape[0], LANE), jnp.float32).at[:, :a.shape[1]].set(a)

    slab = jnp.concatenate([
        pad_lanes(t_aug),                                     # rows [0, 128)
        pad_lanes(pos_s),                                     # rows [128, 192)
        pad_lanes(bias),                                      # rows [192, 256)
        w_lm_pad,                                             # rows [256, 288)
        b_lm_pad,                                             # row  288
        jnp.zeros((SLAB_ROWS - (OFF_BLM + 1), LANE), jnp.float32),
    ], axis=0)
    return slab


def bigram_logits(idx, slab):
    """idx: (B, T) int32. Returns logits (B, T, VOCAB_SIZE)."""
    B, T = idx.shape
    assert B == BATCH and T == BLOCK_SIZE

    # stacked augmented ids: row (h, b, t) -> h * V_PAD + idx[b, t]  (host-side, free)
    idx_flat = idx.reshape(-1).astype(jnp.int32)                       # (BT,)
    idx_aug = (jnp.arange(NUM_HEADS, dtype=jnp.int32)[:, None] * V_PAD
               + idx_flat[None, :]).reshape(STACK, 1)

    logits_padded = pl.pallas_call(
        _bigram_fwd_kernel,
        out_shape=jax.ShapeDtypeStruct((BT, LANE), jnp.float32),
        grid_spec=pltpu.PrefetchScalarGridSpec(
            num_scalar_prefetch=0,
            grid=(1,),
            in_specs=[
                pl.BlockSpec((STACK, 1), lambda i: (0, 0)),        # stacked token ids
                pl.BlockSpec((SLAB_ROWS, LANE), lambda i: (0, 0)),  # packed constants
            ],
            out_specs=pl.BlockSpec((BT, LANE), lambda i: (0, 0)),
        ),
        compiler_params=pltpu.CompilerParams(
            dimension_semantics=("arbitrary",)),
    )(idx_aug, slab)

    return logits_padded[:, :VOCAB_SIZE].reshape(B, T, VOCAB_SIZE)


def bigram_forward(idx, slab, targets=None):
    """Mirrors BigramLanguageModel.forward: returns (logits, loss)."""
    logits = bigram_logits(idx, slab)
    loss = None
    if targets is not None:
        # TODO(synk): cross-entropy loss is a trivial scalar reduction; computed in
        # plain JAX outside the Pallas kernel (not worth a kernel at this size).
        logp = jax.nn.log_softmax(logits.reshape(-1, VOCAB_SIZE), axis=-1)
        loss = -jnp.mean(jnp.take_along_axis(
            logp, targets.reshape(-1, 1).astype(jnp.int32), axis=-1))
    return logits, loss


def _reference_forward(idx, tok_tab, pos_tab, wq, wk, wv, w_lm, b_lm):
    """Pure-JAX replica of the PyTorch forward (incl. dim=1 softmax quirk)."""
    B, T = idx.shape
    x = tok_tab[idx] + pos_tab[None, :T, :]                      # (B, T, C)
    tril = jnp.tril(jnp.ones((T, T), dtype=bool))
    outs = []
    for h in range(NUM_HEADS):
        cs = slice(h * HEAD_SIZE, (h + 1) * HEAD_SIZE)
        q = x @ wq[:, cs]
        k = x @ wk[:, cs]
        v = x @ wv[:, cs]
        wei = q @ jnp.swapaxes(k, -2, -1)                        # no 1/sqrt(hs)
        wei = jnp.where(tril[None], wei, -jnp.inf)
        wei = jax.nn.softmax(wei, axis=1)                        # dim=1 quirk
        outs.append(wei @ v)
    att = jnp.concatenate(outs, axis=-1)                         # (B, T, C)
    return att @ w_lm + b_lm


if __name__ == "__main__":
    key = jax.random.PRNGKey(0)
    k_tok, k_pos, k_q, k_k, k_v, k_lmw, k_lmb = jax.random.split(key, 7)

    B, T, C, V = BATCH, BLOCK_SIZE, N_EMBD, VOCAB_SIZE

    # Deterministic token ids: encode the first B*T+1 chars of the dataset.
    stoi = {ch: i for i, ch in enumerate(CHARS)}
    enc = jnp.asarray([stoi[c] for c in DATASET[:B * T + 1]], dtype=jnp.int32)
    idx = enc[:-1].reshape(B, T)
    targets = enc[1:].reshape(B, T)

    # Parameters (same init families as nn.Embedding / nn.Linear).
    bound = 1.0 / float(C) ** 0.5
    tok_tab = jax.random.normal(k_tok, (V, C), dtype=jnp.float32)
    pos_tab = jax.random.normal(k_pos, (T, C), dtype=jnp.float32)
    wq = jax.random.uniform(k_q, (C, C), minval=-bound, maxval=bound, dtype=jnp.float32)
    wk = jax.random.uniform(k_k, (C, C), minval=-bound, maxval=bound, dtype=jnp.float32)
    wv = jax.random.uniform(k_v, (C, C), minval=-bound, maxval=bound, dtype=jnp.float32)
    w_lm = jax.random.uniform(k_lmw, (C, V), minval=-bound, maxval=bound, dtype=jnp.float32)
    b_lm = jax.random.uniform(k_lmb, (V,), minval=-bound, maxval=bound, dtype=jnp.float32)

    slab = pack_params(tok_tab, pos_tab, wq, wk, wv, w_lm, b_lm)

    logits, loss = bigram_forward(idx, slab, targets=targets)
    logits = jax.block_until_ready(logits)

    ref_logits = _reference_forward(idx, tok_tab, pos_tab, wq, wk, wv, w_lm, b_lm)
    assert logits.shape == (B, T, V)
    assert jnp.allclose(logits, ref_logits, atol=1e-4, rtol=1e-4), (
        float(jnp.max(jnp.abs(logits - ref_logits))))
    assert loss is not None and bool(jnp.isfinite(loss))

    print("KERNEL_OK")
</pallas_src>

<mosaic_0001>
module attributes {stable_mosaic.version = 11 : i64} {
  func.func @_bigram_fwd_kernel(%arg0: i32, %arg1: memref<64x1xi32, #tpu.memory_space<vmem>>, %arg2: memref<296x128xf32, #tpu.memory_space<vmem>>, %arg3: memref<16x128xf32, #tpu.memory_space<vmem>>) attributes {dimension_semantics = [#tpu.dimension_semantics<arbitrary>], iteration_bounds = array<i64: 1>, scalar_prefetch = 0 : i64, scratch_operands = 0 : i64, tpu.core_type = #tpu.core_type<tc>, window_params = [{pipeline_mode = #tpu.pipeline_mode<synchronous>, transform_indices = @transform_0, window_bounds = array<i64: 64, 1>}, {pipeline_mode = #tpu.pipeline_mode<synchronous>, transform_indices = @transform_1, window_bounds = array<i64: 296, 128>}, {pipeline_mode = #tpu.pipeline_mode<synchronous>, transform_indices = @transform_2, window_bounds = array<i64: 16, 128>}]} {
    %c0 = arith.constant 0 : index
    %c0_0 = arith.constant 0 : index
    %0 = vector.load %arg1[%c0, %c0_0] : memref<64x1xi32, #tpu.memory_space<vmem>>, vector<64x1xi32>
    %1 = tpu.iota {dimensions = array<i32: 1>} : vector<64x128xi32>
    %2 = vector.broadcast %0 : vector<64x1xi32> to vector<64x128xi32>
    %3 = arith.cmpi eq, %1, %2 : vector<64x128xi32>
    %4 = arith.extui %3 : vector<64x128xi1> to vector<64x128xi32>
    %5 = arith.sitofp %4 : vector<64x128xi32> to vector<64x128xf32>
    %c0_1 = arith.constant 0 : index
    %c0_2 = arith.constant 0 : index
    %6 = vector.load %arg2[%c0_1, %c0_2] : memref<296x128xf32, #tpu.memory_space<vmem>>, vector<128x128xf32>
    %7 = vector.extract_strided_slice %6 {offsets = [0, 0], sizes = [128, 24], strides = [1, 1]} : vector<128x128xf32> to vector<128x24xf32>
    %c128 = arith.constant 128 : index
    %c0_3 = arith.constant 0 : index
    %8 = vector.load %arg2[%c128, %c0_3] : memref<296x128xf32, #tpu.memory_space<vmem>>, vector<64x128xf32>
    %9 = vector.extract_strided_slice %8 {offsets = [0, 0], sizes = [64, 24], strides = [1, 1]} : vector<64x128xf32> to vector<64x24xf32>
    %c192 = arith.constant 192 : index
    %c0_4 = arith.constant 0 : index
    %10 = vector.load %arg2[%c192, %c0_4] : memref<296x128xf32, #tpu.memory_space<vmem>>, vector<64x128xf32>
    %11 = vector.extract_strided_slice %10 {offsets = [0, 0], sizes = [64, 64], strides = [1, 1]} : vector<64x128xf32> to vector<64x64xf32>
    %c256 = arith.constant 256 : index
    %c0_5 = arith.constant 0 : index
    %12 = vector.load %arg2[%c256, %c0_5] : memref<296x128xf32, #tpu.memory_space<vmem>>, vector<32x128xf32>
    %c288 = arith.constant 288 : index
    %c0_6 = arith.constant 0 : index
    %13 = vector.load %arg2[%c288, %c0_6] : memref<296x128xf32, #tpu.memory_space<vmem>>, vector<1x128xf32>
    %cst = arith.constant dense<0.000000e+00> : vector<64x24xf32>
    %14 = tpu.matmul %5, %7, %cst {dimension_numbers = #tpu.dot_dimension_numbers<[1], [0], [0], [1], [0, 0, 1, 1], [], []>} : vector<64x128xf32>, vector<128x24xf32>, vector<64x24xf32> -> vector<64x24xf32>
    %15 = arith.addf %14, %9 : vector<64x24xf32>
    %16 = vector.extract_strided_slice %15 {offsets = [0, 0], sizes = [64, 8], strides = [1, 1]} : vector<64x24xf32> to vector<64x8xf32>
    %17 = vector.extract_strided_slice %15 {offsets = [0, 8], sizes = [64, 8], strides = [1, 1]} : vector<64x24xf32> to vector<64x8xf32>
    %18 = vector.extract_strided_slice %15 {offsets = [0, 16], sizes = [64, 8], strides = [1, 1]} : vector<64x24xf32> to vector<64x8xf32>
    %cst_7 = arith.constant dense<0.000000e+00> : vector<64x64xf32>
    %19 = tpu.matmul %16, %17, %cst_7 {dimension_numbers = #tpu.dot_dimension_numbers<[1], [1], [0], [0], [0, 0, 1, 0], [], []>} : vector<64x8xf32>, vector<64x8xf32>, vector<64x64xf32> -> vector<64x64xf32>
    %20 = arith.addf %19, %11 : vector<64x64xf32>
    %cst_8 = arith.constant dense<0xFF800000> : vector<64xf32>
    %21 = vector.multi_reduction <maximumf>, %20, %cst_8 [0] : vector<64x64xf32> to vector<64xf32>
    %22 = vector.shape_cast %21 : vector<64xf32> to vector<1x64xf32>
    %23 = vector.broadcast %22 : vector<1x64xf32> to vector<64x64xf32>
    %24 = arith.subf %20, %23 : vector<64x64xf32>
    %25 = math.exp %24 : vector<64x64xf32>
    %cst_9 = arith.constant dense<0.000000e+00> : vector<64xf32>
    %26 = vector.multi_reduction <add>, %25, %cst_9 [0] : vector<64x64xf32> to vector<64xf32>
    %27 = vector.shape_cast %26 : vector<64xf32> to vector<1x64xf32>
    %28 = tpu.reciprocal %27 : vector<1x64xf32> -> vector<1x64xf32>
    %29 = vector.broadcast %28 : vector<1x64xf32> to vector<64x64xf32>
    %30 = arith.mulf %25, %29 : vector<64x64xf32>
    %cst_10 = arith.constant dense<0.000000e+00> : vector<64x8xf32>
    %31 = tpu.matmul %30, %18, %cst_10 {dimension_numbers = #tpu.dot_dimension_numbers<[1], [0], [0], [1], [0, 0, 1, 1], [], []>} : vector<64x64xf32>, vector<64x8xf32>, vector<64x8xf32> -> vector<64x8xf32>
    %32 = vector.extract_strided_slice %31 {offsets = [0, 0], sizes = [16, 8], strides = [1, 1]} : vector<64x8xf32> to vector<16x8xf32>
    %33 = vector.extract_strided_slice %31 {offsets = [16, 0], sizes = [16, 8], strides = [1, 1]} : vector<64x8xf32> to vector<16x8xf32>
    %34 = vector.extract_strided_slice %31 {offsets = [32, 0], sizes = [16, 8], strides = [1, 1]} : vector<64x8xf32> to vector<16x8xf32>
    %35 = vector.extract_strided_slice %31 {offsets = [48, 0], sizes = [16, 8], strides = [1, 1]} : vector<64x8xf32> to vector<16x8xf32>
    %36 = tpu.concatenate %32, %33, %34, %35 in 1 : vector<16x8xf32>, vector<16x8xf32>, vector<16x8xf32>, vector<16x8xf32> -> vector<16x32xf32>
    %cst_11 = arith.constant dense<0.000000e+00> : vector<16x128xf32>
    %37 = tpu.matmul %36, %12, %cst_11 {dimension_numbers = #tpu.dot_dimension_numbers<[1], [0], [0], [1], [0, 0, 1, 1], [], []>} : vector<16x32xf32>, vector<32x128xf32>, vector<16x128xf32> -> vector<16x128xf32>
    %38 = vector.broadcast %13 : vector<1x128xf32> to vector<16x128xf32>
    %39 = arith.addf %37, %38 : vector<16x128xf32>
    %c0_12 = arith.constant 0 : index
    %c0_13 = arith.constant 0 : index
    %40 = vector.load %arg3[%c0_12, %c0_13] : memref<16x128xf32, #tpu.memory_space<vmem>>, vector<16x128xf32>
    tpu.vector_store %arg3[%c0_12, %c0_13], %39 {strides = array<i32>} : memref<16x128xf32, #tpu.memory_space<vmem>>, vector<16x128xf32>,
    return
  }
  func.func @transform_0(%arg0: i32) -> (i32, i32) {
    %c0_i32 = arith.constant 0 : i32
    %c0_i32_0 = arith.constant 0 : i32
    %c0_i32_1 = arith.constant 0 : i32
    return %c0_i32, %c0_i32_0 : i32, i32
  }
  func.func @transform_1(%arg0: i32) -> (i32, i32) {
    %c0_i32 = arith.constant 0 : i32
    %c0_i32_0 = arith.constant 0 : i32
    %c0_i32_1 = arith.constant 0 : i32
    return %c0_i32, %c0_i32_0 : i32, i32
  }
  func.func @transform_2(%arg0: i32) -> (i32, i32) {
    %c0_i32 = arith.constant 0 : i32
    %c0_i32_0 = arith.constant 0 : i32
    %c0_i32_1 = arith.constant 0 : i32
    return %c0_i32, %c0_i32_0 : i32, i32
  }
}

</mosaic_0001>

<bundles_post_ra>
// kernel: tpu_custom_call.1
= control target key start
LH: loop header
LB: loop body
LE: loop exit
PB: predicated region body
PF: predicated region fallthrough
CT: control target
= control target key end

     0   :  { %7 = vsyncpa [#allocation3], 0  ;;  %s1187_s0 = inlined_call_operand.vmem [shape: s32[64,1], index: 0, kind: input, shape index: {}]   ;;  %s1188_s1 = inlined_call_operand.hbm [shape: f32[296,128], index: 1, kind: input, shape index: {}]   ;;  %s1189_s2 = inlined_call_operand.hbm [shape: f32[16,128], index: 2, kind: output, shape index: {}]  }
   0x1   :  { %8 = vsyncpa [#allocation4], 0  ;;  %s1044_s9 = smov [#allocation2]  }
   0x2   :  { %s16_s10 = sshll.u32 %s1044_s9, 4  ;;  %s17_s10 = int_to_ptr.vmem [resolvable:$true] %s16_s10 }
   0x3   :  { %s1008_s11 = scalar_lea.vmem %s17_s10, 4736  ;;  %p1013_p1 = scmp.lt.s32.totalorder %s17_s10, %s17_s10 }
   0x4   :  { %p1009_p0 = scmp.ne.s32.totalorder %s17_s10, %s1008_s11  ;;  %p1014_p2 = scmp.lt.s32.totalorder %s1008_s11, %s1008_s11 }
   0x6   :  { %p1015_p3 = por %p1014_p2, %p1013_p1 }
   0x8   :  { %p1016_p4 = pnand %p1015_p3, %p1009_p0 }
   0xa   :  { %1019 = shalt.err (!%p1016_p4)
}
   0xb   :  { %s1045_s12 = smov 128   ;;  %s1046_s13 = smov 8  }
   0xc   :  { %22 = dma.hbm_to_vmem [thread:$0]  %s1188_s1, 4736, %s17_s10, [#allocation3], %s1045_s12, %s1045_s12, %s1046_s13  }
   0xd   :  { %1040 = dma.done.wait [#allocation3], 4736  }
   0xe   :  { %1041 = vsyncadd [#allocation3], 4294962560  ;;  %v1047_v0 = vmov 0   ;;  %v28_v1 = vld [vmem:[%s1187_s0 + $0x10] sm:$0xff]  ;;  %v26_v2 = vld [vmem:[%s1187_s0] sm:$0xff]  ;;  %v34_v25 = vlaneseq  ;;  %v1048_v29 = vmov 1.0  }
   0xf   :  { %981 = vset.pattern.permute.xlu1 %v1047_v0  ;;  %980 = vset.pattern.permute.xlu0 %v1047_v0  ;;  %v29_v3 = vld [vmem:[%s1187_s0 + $0x18] sm:$0xff]  ;;  %v27_v4 = vld [vmem:[%s1187_s0 + $0x8] sm:$0xff]  ;;  %v98_v6 = vld [vmem:[#allocation2 + $0x70] sm:$0xff]  ;;  %vm250_vm8 = vcmask 64512   ;;  %s1050_s3 = smov 112   ;;  %vm388_vm9 = vcmask 523264  }
  0x10   :  { %43 = vperm.xlu1 %981, %v28_v1   ;;  %37 = vperm.xlu0 %980, %v26_v2   ;;  %v99_v5 = vld [vmem:[#allocation2 + $0x78] sm:$0xff]  ;;  %v97_v7 = vld [vmem:[#allocation2 + $0x68] sm:$0xff]  ;;  %v30_v9 = vld [vmem:[%s1187_s0 + $0x20] sm:$0xff]  ;;  %v35_v26 = vand.u32 127, %v34_v25  ;;  %s1051_s4 = smov 16   ;;  %s1052_s5 = smov 24  }
  0x11   :  { %859 = vmatprep.subr.mxu0 %v99_v5  ;;  %v31_v8 = vld [vmem:[%s1187_s0 + $0x28] sm:$0xff]  ;;  %v96_v10 = vld [vmem:[#allocation2 + $0x60] sm:$0xff]  ;;  %v33_v11 = vld [vmem:[%s1187_s0 + $0x38] sm:$0xff]  ;;  %vm643_vm10 = vcmask 130048   ;;  %vm646_vm11 = vcmask 195584   ;;  %vm653_vm12 = vcmask 261120  }
  0x12   :  { %860 = vmatpush3.msra.mxu0 %v99_v5  ;;  %v32_v12 = vld [vmem:[%s1187_s0 + $0x30] sm:$0xff]  ;;  %v95_v13 = vld [vmem:[#allocation2 + $0x58] sm:$0xff]  ;;  %v93_v15 = vld [vmem:[#allocation2 + $0x48] sm:$0xff]  ;;  %s1049_s0 = smov 120   ;;  %s1053_s6 = smov [#allocation5]  }
  0x13   :  { %861 = vmatprep.subr.mxu0 %v98_v6  ;;  %v94_v14 = vld [vmem:[#allocation2 + $0x50] sm:$0xff]  ;;  %v92_v16 = vld [vmem:[#allocation2 + $0x40] sm:$0xff]  ;;  %v91_v17 = vld [vmem:[#allocation2 + $0x38] sm:$0xff]  ;;  %s742_s7 = sshll.u32 %s1053_s6, 4  ;;  %s743_s7 = int_to_ptr.vmem [resolvable:$true] %s742_s7 }
  0x14   :  { %46 = vperm.xlu1 %981, %v29_v3   ;;  %40 = vperm.xlu0 %980, %v27_v4   ;;  %v90_v18 = vld [vmem:[#allocation2 + $0x30] sm:$0xff]  ;;  %v89_v19 = vld [vmem:[#allocation2 + $0x28] sm:$0xff]  ;;  %v88_v20 = vld [vmem:[#allocation2 + $0x20] sm:$0xff]  ;;  %s1020_s8 = scalar_lea.vmem %s743_s7, 256  ;;  %p1025_p6 = scmp.lt.s32.totalorder %s743_s7, %s743_s7 }
  0x15   :  { %862 = vmatpush3.msra.mxu0 %v98_v6  ;;  %v87_v21 = vld [vmem:[#allocation2 + $0x18] sm:$0xff]  ;;  %v86_v22 = vld [vmem:[#allocation2 + $0x10] sm:$0xff]  ;;  %v85_v23 = vld [vmem:[#allocation2 + $0x8] sm:$0xff]  ;;  %p1021_p5 = scmp.ne.s32.totalorder %s743_s7, %s1020_s8  ;;  %p1026_p7 = scmp.lt.s32.totalorder %s1020_s8, %s1020_s8 }
  0x16   :  { %863 = vmatprep.subr.mxu0 %v97_v7  ;;  %v84_v24 = vld [vmem:[#allocation2] sm:$0xff]  ;;  %v107_v44 = vld [vmem:[#allocation2 + $0xb8] sm:$0xff]  ;;  %v106_v46 = vld [vmem:[#allocation2 + $0xb0] sm:$0xff] }
  0x17   :  { %864 = vmatpush3.msra.mxu0 %v97_v7  ;;  %v100_v37 = vld [vmem:[#allocation2 + $0x80] sm:$0xff]  ;;  %v105_v48 = vld [vmem:[#allocation2 + $0xa8] sm:$0xff]  ;;  %v103_v53 = vld [vmem:[#allocation2 + $0x98] sm:$0xff]  ;;  %p1027_p8 = por %p1026_p7, %p1025_p6 }
  0x18   :  { %52 = vperm.xlu1 %981, %v31_v8   ;;  %49 = vperm.xlu0 %980, %v30_v9   ;;  %v104_v51 = vld [vmem:[#allocation2 + $0xa0] sm:$0xff]  ;;  %v102_v55 = vld [vmem:[#allocation2 + $0x90] sm:$0xff]  ;;  %v101_v57 = vld [vmem:[#allocation2 + $0x88] sm:$0xff] }
  0x19   :  { %865 = vmatprep.subr.mxu0 %v96_v10  ;;  %p1028_p9 = pnand %p1027_p8, %p1021_p5 }
  0x1a   :  { %866 = vmatpush3.msra.mxu0 %v96_v10 }
  0x1b   :  { %867 = vmatprep.subr.mxu0 %v95_v13 }
  0x1c   :  { %58 = vperm.xlu1 %981, %v33_v11   ;;  %55 = vperm.xlu0 %980, %v32_v12  }
  0x1d   :  { %868 = vmatpush3.msra.mxu0 %v95_v13 }
  0x1e   :  { %869 = vmatprep.subr.mxu0 %v94_v14 }
  0x1f   :  { %870 = vmatpush3.msra.mxu0 %v94_v14 }
  0x20   :  { %871 = vmatprep.subr.mxu0 %v93_v15 }
  0x21   :  { %872 = vmatpush3.msra.mxu0 %v93_v15 }
  0x22   :  { %873 = vmatprep.subr.mxu0 %v92_v16 }
  0x23   :  { %874 = vmatpush3.msra.mxu0 %v92_v16  ;;  %v108_v16 = vld [vmem:[#allocation2 + $0xc0] sm:$0xff] }
  0x24   :  { %875 = vmatprep.subr.mxu0 %v91_v17 }
  0x25   :  { %876 = vmatpush3.msra.mxu0 %v91_v17  ;;  %v113_v17 = vld [vmem:[#allocation2 + $0xe8] sm:$0xff] }
  0x26   :  { %877 = vmatprep.subr.mxu0 %v90_v18 }
  0x27   :  { %878 = vmatpush3.msra.mxu0 %v90_v18 }
  0x28   :  { %879 = vmatprep.subr.mxu0 %v89_v19 }
  0x29   :  { %880 = vmatpush3.msra.mxu0 %v89_v19  ;;  %v112_v19 = vld [vmem:[#allocation2 + $0xe0] sm:$0xff] }
  0x2a   :  { %881 = vmatprep.subr.mxu0 %v88_v20 }
  0x2b   :  { %882 = vmatpush3.msra.mxu0 %v88_v20  ;;  %v109_v20 = vld [vmem:[#allocation2 + $0xc8] sm:$0xff] }
  0x2c   :  { %883 = vmatprep.subr.mxu0 %v87_v21 }
  0x2d   :  { %884 = vmatpush3.msra.mxu0 %v87_v21  ;;  %v111_v21 = vld [vmem:[#allocation2 + $0xd8] sm:$0xff] }
  0x2e   :  { %885 = vmatprep.subr.mxu0 %v86_v22 }
  0x2f   :  { %886 = vmatpush3.msra.mxu0 %v86_v22  ;;  %v110_v22 = vld [vmem:[#allocation2 + $0xd0] sm:$0xff] }
  0x30   :  { %887 = vmatprep.subr.mxu0 %v85_v23 }
  0x31   :  { %888 = vmatpush3.msra.mxu0 %v85_v23 }
  0x32   :  { %889 = vmatprep.subr.mxu0 %v84_v24 }
  0x33   :  { %890 = vmatpush3.msra.mxu0 %v84_v24  ;;  %v115_v24 = vld [vmem:[#allocation2 + $0xf8] sm:$0xff] }
  0x8b   :  { %v44_v27 = vpop.permute.xlu1 %43  ;;  %v38_v28 = vpop.permute.xlu0 %37 }
  0x8c   :  { %vm60_vm0 = vcmp.eq.s32.totalorder %v35_v26, %v38_v28  ;;  %vm62_vm1 = vcmp.eq.s32.totalorder %v35_v26, %v44_v27 }
  0x8d   :  { %891 = vmatprep.mubr.msk.f32.mxu0 %vm60_vm0, %v1048_v29 }
  0x8f   :  { %v47_v30 = vpop.permute.xlu1 %46  ;;  %v41_v31 = vpop.permute.xlu0 %40 }
  0x90   :  { %vm61_vm2 = vcmp.eq.s32.totalorder %v35_v26, %v41_v31  ;;  %vm63_vm3 = vcmp.eq.s32.totalorder %v35_v26, %v47_v30  ;;  %v114_v30 = vld [vmem:[#allocation2 + $0xf0] sm:$0xff] }
  0x91   :  { %892 = vmatmul.mubr.msk.f32.vlgmr.msra.gmra.mxu0 %vm61_vm2, %v1048_v29 }
  0x92   :  { %894 = vmatprep.mubr.msk.f32.mxu0 %vm62_vm1, %v1048_v29 }
  0x93   :  { %v53_v32 = vpop.permute.xlu1 %52  ;;  %v50_v33 = vpop.permute.xlu0 %49 }
  0x94   :  { %vm64_vm4 = vcmp.eq.s32.totalorder %v35_v26, %v50_v33  ;;  %vm65_vm5 = vcmp.eq.s32.totalorder %v35_v26, %v53_v32 }
  0x95   :  { %895 = vmatmul.mubr.msk.f32.gmra.mxu0 %vm63_vm3, %v1048_v29 }
  0x96   :  { %897 = vmatprep.mubr.msk.f32.mxu0 %vm64_vm4, %v1048_v29 }
  0x97   :  { %v56_v34 = vpop.permute.xlu0 %55  ;;  %v59_v35 = vpop.permute.xlu1 %58 }
  0x98   :  { %vm66_vm6 = vcmp.eq.s32.totalorder %v35_v26, %v56_v34  ;;  %vm67_vm7 = vcmp.eq.s32.totalorder %v35_v26, %v59_v35 }
  0x99   :  { %898 = vmatmul.mubr.msk.f32.gmra.mxu0 %vm65_vm5, %v1048_v29 }
  0x9a   :  { %900 = vmatprep.mubr.msk.f32.mxu0 %vm66_vm6, %v1048_v29 }
  0x9d   :  { %901 = vmatmul.mubr.msk.f32.gmra.mxu0 %vm67_vm7, %v1048_v29 }
 0x151   :  { %v893_v36 = vpop.f32.mrf.mxu0 }
 0x152   :  { %v193_v59 = vadd.f32 %v893_v36, %v101_v57 }
 0x153   :  { %v187_v38 = vpop.f32.mrf.mxu0 }
 0x154   :  { %v188_v39 = vadd.f32 %v187_v38, %v100_v37 }
 0x155   :  { %v896_v40 = vpop.f32.mrf.mxu0 }
 0x156   :  { %919 = vmatprep.mubr.msk.f32.mxu1 %vm250_vm8, %v188_v39  ;;  %v1111_v56 = vadd.f32 %v896_v40, %v103_v53 }
 0x157   :  { %v197_v41 = vpop.f32.mrf.mxu0 }
 0x158   :  { %v1114_v58 = vadd.f32 %v197_v41, %v102_v55 }
 0x159   :  { %v899_v42 = vpop.f32.mrf.mxu0 }
 0x15a   :  { %v1105_v52 = vadd.f32 %v899_v42, %v105_v48 }
 0x15b   :  { %v207_v43 = vpop.f32.mrf.mxu0 }
 0x15c   :  { %v1108_v54 = vadd.f32 %v207_v43, %v104_v51 }
 0x15d   :  { %v902_v45 = vpop.f32.mrf.mxu0 }
 0x15e   :  { %v1100_v47 = vadd.f32 %v902_v45, %v107_v44 }
 0x15f   :  { %v217_v49 = vpop.f32.mrf.mxu0 }
 0x160   :  { %v1102_v50 = vadd.f32 %v217_v49, %v106_v46  ;;  %248 = vrot.lane.b32.xlu0 %v1100_v47, %s1049_s0 }
 0x162   :  { %246 = vrot.lane.b32.xlu1 %v1102_v50, %s1049_s0 }
 0x164   :  { %244 = vrot.lane.b32.xlu0 %v1105_v52, %s1049_s0 }
 0x166   :  { %242 = vrot.lane.b32.xlu1 %v1108_v54, %s1049_s0 }
 0x168   :  { %240 = vrot.lane.b32.xlu0 %v1111_v56, %s1049_s0 }
 0x16a   :  { %238 = vrot.lane.b32.xlu1 %v1114_v58, %s1049_s0 }
 0x16c   :  { %236 = vrot.lane.b32.xlu0 %v193_v59, %s1049_s0 }
 0x16e   :  { %234 = vrot.lane.b32.xlu1 %v188_v39, %s1049_s0 }
 0x170   :  { %478 = vrot.lane.b32.xlu0 %v1100_v47, %s1050_s3 }
 0x172   :  { %476 = vrot.lane.b32.xlu1 %v1102_v50, %s1050_s3 }
 0x174   :  { %474 = vrot.lane.b32.xlu0 %v1105_v52, %s1050_s3 }
 0x176   :  { %472 = vrot.lane.b32.xlu1 %v1108_v54, %s1050_s3 }
 0x178   :  { %470 = vrot.lane.b32.xlu0 %v1111_v56, %s1050_s3 }
 0x17a   :  { %468 = vrot.lane.b32.xlu1 %v1114_v58, %s1050_s3 }
 0x17c   :  { %466 = vrot.lane.b32.xlu0 %v193_v59, %s1050_s3 }
 0x17e   :  { %464 = vrot.lane.b32.xlu1 %v188_v39, %s1050_s3 }
 0x1d2   :  { %v249_v60 = vpop.permute.xlu0 %248 }
 0x1d3   :  { %903 = vmatprep.subr.msk.mxu1 %vm250_vm8, %v249_v60 }
 0x1d4   :  { %904 = vmatpush3.xpose.msk.msra.mxu1 %vm250_vm8, %v249_v60  ;;  %v247_v61 = vpop.permute.xlu1 %246 }
 0x1d5   :  { %905 = vmatprep.subr.msk.mxu1 %vm250_vm8, %v247_v61 }
 0x1d6   :  { %v245_v62 = vpop.permute.xlu0 %244 }
 0x1d8   :  { %906 = vmatpush3.xpose.msk.msra.mxu1 %vm250_vm8, %v247_v61  ;;  %v243_v63 = vpop.permute.xlu1 %242 }
 0x1d9   :  { %907 = vmatprep.subr.msk.mxu1 %vm250_vm8, %v245_v62 }
 0x1da   :  { %v241_v0 = vpop.permute.xlu0 %240 }
 0x1dc   :  { %908 = vmatpush3.xpose.msk.msra.mxu1 %vm250_vm8, %v245_v62  ;;  %v239_v1 = vpop.permute.xlu1 %238 }
 0x1dd   :  { %909 = vmatprep.subr.msk.mxu1 %vm250_vm8, %v243_v63 }
 0x1de   :  { %v237_v2 = vpop.permute.xlu0 %236 }
 0x1e0   :  { %910 = vmatpush3.xpose.msk.msra.mxu1 %vm250_vm8, %v243_v63  ;;  %v235_v3 = vpop.permute.xlu1 %234 }
 0x1e1   :  { %911 = vmatprep.subr.msk.mxu1 %vm250_vm8, %v241_v0 }
 0x1e2   :  { %v479_v4 = vpop.permute.xlu0 %478 }
 0x1e3   :  { %931 = vmatprep.subr.mxu0 %v479_v4 }
 0x1e4   :  { %912 = vmatpush3.xpose.msk.msra.mxu1 %vm250_vm8, %v241_v0  ;;  %932 = vmatpush3.msra.mxu0 %v479_v4  ;;  %v477_v5 = vpop.permute.xlu1 %476 }
 0x1e5   :  { %913 = vmatprep.subr.msk.mxu1 %vm250_vm8, %v239_v1  ;;  %933 = vmatprep.subr.mxu0 %v477_v5 }
 0x1e6   :  { %v475_v6 = vpop.permute.xlu0 %474  ;;  %934 = vmatpush3.msra.mxu0 %v477_v5 }
 0x1e7   :  { %935 = vmatprep.subr.mxu0 %v475_v6 }
 0x1e8   :  { %914 = vmatpush3.xpose.msk.msra.mxu1 %vm250_vm8, %v239_v1  ;;  %936 = vmatpush3.msra.mxu0 %v475_v6  ;;  %v473_v7 = vpop.permute.xlu1 %472 }
 0x1e9   :  { %915 = vmatprep.subr.msk.mxu1 %vm250_vm8, %v237_v2  ;;  %937 = vmatprep.subr.mxu0 %v473_v7 }
 0x1ea   :  { %v471_v8 = vpop.permute.xlu0 %470  ;;  %938 = vmatpush3.msra.mxu0 %v473_v7 }
 0x1eb   :  { %939 = vmatprep.subr.mxu0 %v471_v8 }
 0x1ec   :  { %916 = vmatpush3.xpose.msk.msra.mxu1 %vm250_vm8, %v237_v2  ;;  %940 = vmatpush3.msra.mxu0 %v471_v8  ;;  %v469_v9 = vpop.permute.xlu1 %468 }
 0x1ed   :  { %917 = vmatprep.subr.msk.mxu1 %vm250_vm8, %v235_v3  ;;  %941 = vmatprep.subr.mxu0 %v469_v9 }
 0x1ee   :  { %v467_v10 = vpop.permute.xlu0 %466  ;;  %942 = vmatpush3.msra.mxu0 %v469_v9 }
 0x1ef   :  { %943 = vmatprep.subr.mxu0 %v467_v10 }
 0x1f0   :  { %918 = vmatpush3.xpose.msk.msra.mxu1 %vm250_vm8, %v235_v3  ;;  %944 = vmatpush3.msra.mxu0 %v467_v10  ;;  %v465_v11 = vpop.permute.xlu1 %464 }
 0x1f1   :  { %945 = vmatprep.subr.mxu0 %v465_v11 }
 0x1f2   :  { %946 = vmatpush3.msra.mxu0 %v465_v11 }
 0x1f3   :  { %920 = vmatmul.mubr.msk.f32.vlgmr.msra.gmra.mxu1 %vm250_vm8, %v193_v59 }
 0x1f4   :  { %922 = vmatprep.mubr.msk.f32.mxu1 %vm250_vm8, %v1114_v58 }
 0x1f7   :  { %923 = vmatmul.mubr.msk.f32.gmra.mxu1 %vm250_vm8, %v1111_v56 }
 0x1f8   :  { %925 = vmatprep.mubr.msk.f32.mxu1 %vm250_vm8, %v1108_v54 }
 0x1fb   :  { %926 = vmatmul.mubr.msk.f32.gmra.mxu1 %vm250_vm8, %v1105_v52 }
 0x1fc   :  { %928 = vmatprep.mubr.msk.f32.mxu1 %vm250_vm8, %v1102_v50 }
 0x1ff   :  { %929 = vmatmul.mubr.msk.f32.gmra.mxu1 %vm250_vm8, %v1100_v47 }
 0x2b3   :  { %v921_v12 = vpop.f32.mrf.mxu1 }
 0x2b4   :  { %v355_v28 = vadd.f32 %v921_v12, %v109_v20 }
 0x2b5   :  { %v349_v13 = vpop.f32.mrf.mxu1 }
 0x2b6   :  { %v350_v25 = vadd.f32 %v349_v13, %v108_v16  ;;  %v390_v41 = vsel %vm388_vm9, %v355_v28, -inf }
 0x2b7   :  { %v924_v14 = vpop.f32.mrf.mxu1 }
 0x2b8   :  { %v365_v31 = vadd.f32 %v924_v14, %v111_v21  ;;  %v389_v36 = vsel %vm388_vm9, %v350_v25, -inf }
 0x2b9   :  { %v359_v15 = vpop.f32.mrf.mxu1 }
 0x2ba   :  { %v360_v32 = vadd.f32 %v359_v15, %v110_v22  ;;  %v392_v42 = vsel %vm388_vm9, %v365_v31, -inf }
 0x2bb   :  { %v927_v18 = vpop.f32.mrf.mxu1 }
 0x2bc   :  { %v375_v26 = vadd.f32 %v927_v18, %v113_v17  ;;  %v391_v43 = vsel %vm388_vm9, %v360_v32, -inf }
 0x2bd   :  { %v369_v23 = vpop.f32.mrf.mxu1 }
 0x2be   :  { %v370_v27 = vadd.f32 %v369_v23, %v112_v19  ;;  %v395_v37 = vsel %vm388_vm9, %v375_v26, -inf }
 0x2bf   :  { %v930_v29 = vpop.f32.mrf.mxu1  ;;  %v396_v45 = vmax.f32 %v390_v41, %v395_v37 }
 0x2c0   :  { %v393_v33 = vsel %vm388_vm9, %v370_v27, -inf  ;;  %v385_v34 = vadd.f32 %v930_v29, %v115_v24 }
 0x2c1   :  { %v379_v35 = vpop.f32.mrf.mxu1  ;;  %v394_v40 = vmax.f32 %v389_v36, %v393_v33 }
 0x2c2   :  { %v399_v38 = vsel %vm388_vm9, %v385_v34, -inf  ;;  %v380_v39 = vadd.f32 %v379_v35, %v114_v30 }
 0x2c3   :  { %v400_v46 = vmax.f32 %v392_v42, %v399_v38  ;;  %v401_v48 = vmax.f32 %v394_v40, %v396_v45 }
 0x2c4   :  { %v397_v44 = vsel %vm388_vm9, %v380_v39, -inf }
 0x2c5   :  { %v398_v47 = vmax.f32 %v391_v43, %v397_v44 }
 0x2c7   :  { %v402_v49 = vmax.f32 %v398_v47, %v400_v46  ;;  %v119_v47 = vld [vmem:[#allocation2 + $0x118] sm:$0xff] }
 0x2c8   :  { %959 = vmatprep.subr.mxu1 %v119_v47 }
 0x2c9   :  { %v403_v50 = vmax.f32 %v401_v48, %v402_v49  ;;  %v118_v48 = vld [vmem:[#allocation2 + $0x110] sm:$0xff]  ;;  %960 = vmatpush3.msra.mxu1 %v119_v47  ;;  %v117_v49 = vld [vmem:[#allocation2 + $0x108] sm:$0xff] }
 0x2ca   :  { %961 = vmatprep.subr.mxu1 %v118_v48 }
 0x2cb   :  { %v404_v51 = vrot.slane %v403_v50, 4  ;;  %962 = vmatpush3.msra.mxu1 %v118_v48 }
 0x2cc   :  { %963 = vmatprep.subr.mxu1 %v117_v49 }
 0x2cd   :  { %v405_v52 = vmax.f32 %v403_v50, %v404_v51  ;;  %964 = vmatpush3.msra.mxu1 %v117_v49  ;;  %v116_v50 = vld [vmem:[#allocation2 + $0x100] sm:$0xff] }
 0x2ce   :  { %965 = vmatprep.subr.mxu1 %v116_v50 }
 0x2cf   :  { %v406_v53 = vrot.slane %v405_v52, 2  ;;  %966 = vmatpush3.msra.mxu1 %v116_v50 }
 0x2d1   :  { %v407_v54 = vmax.f32 %v405_v52, %v406_v53 }
 0x2d3   :  { %v408_v55 = vrot.slane %v407_v54, 1 }
 0x2d5   :  { %v409_v56 = vmax.f32 %v407_v54, %v408_v55 }
 0x2d7   :  { %v410_v57 = vsub.f32 %v350_v25, %v409_v56  ;;  %v411_v58 = vsub.f32 %v355_v28, %v409_v56  ;;  %v412_v59 = vsub.f32 %v360_v32, %v409_v56  ;;  %v413_v60 = vsub.f32 %v365_v31, %v409_v56 }
 0x2d8   :  { %v414_v61 = vsub.f32 %v370_v27, %v409_v56  ;;  %v415_v1 = vsub.f32 %v375_v26, %v409_v56  ;;  %v416_v3 = vsub.f32 %v380_v39, %v409_v56  ;;  %v417_v5 = vsub.f32 %v385_v34, %v409_v56 }
 0x2d9   :  { %v418_v62 = vmul.f32 1.442695, %v410_v57  ;;  %v420_v63 = vmul.f32 1.442695, %v411_v58  ;;  %v422_v0 = vmul.f32 1.442695, %v412_v59 }
 0x2da   :  { %v424_v2 = vmul.f32 1.442695, %v413_v60  ;;  %v426_v4 = vmul.f32 1.442695, %v414_v61  ;;  %v428_v6 = vmul.f32 1.442695, %v415_v1 }
 0x2db   :  { %982 = vpow2.f32 %v418_v62  ;;  %v430_v7 = vmul.f32 1.442695, %v416_v3  ;;  %v432_v8 = vmul.f32 1.442695, %v417_v5 }
 0x2dc   :  { %984 = vpow2.f32 %v420_v63 }
 0x2dd   :  { %986 = vpow2.f32 %v422_v0 }
 0x2de   :  { %988 = vpow2.f32 %v424_v2 }
 0x2df   :  { %990 = vpow2.f32 %v426_v4 }
 0x2e0   :  { %992 = vpow2.f32 %v428_v6 }
 0x2e1   :  { %994 = vpow2.f32 %v430_v7  ;;  %v794_v7 = vld [vmem:[#allocation2 + $0x120] ss:$0 sm:$0xff] }
 0x2e2   :  { %996 = vpow2.f32 %v432_v8 }
 0x2e8   :  { %v983_v9 = vpop.eup %982 }
 0x2e9   :  { %v985_v10 = vpop.eup %984  ;;  %v434_v11 = vsel %vm388_vm9, %v983_v9, 0.0 }
 0x2ea   :  { %v987_v12 = vpop.eup %986  ;;  %v435_v13 = vsel %vm388_vm9, %v985_v10, 0.0 }
 0x2eb   :  { %v989_v14 = vpop.eup %988  ;;  %v436_v15 = vadd.f32 %v435_v13, %v434_v11  ;;  %v437_v16 = vsel %vm388_vm9, %v987_v12, 0.0 }
 0x2ec   :  { %v991_v17 = vpop.eup %990  ;;  %v439_v19 = vsel %vm388_vm9, %v989_v14, 0.0 }
 0x2ed   :  { %v438_v18 = vadd.f32 %v437_v16, %v436_v15  ;;  %v993_v20 = vpop.eup %992  ;;  %v441_v22 = vsel %vm388_vm9, %v991_v17, 0.0 }
 0x2ee   :  { %v995_v23 = vpop.eup %994  ;;  %v443_v25 = vsel %vm388_vm9, %v993_v20, 0.0 }
 0x2ef   :  { %v440_v21 = vadd.f32 %v439_v19, %v438_v18  ;;  %v997_v26 = vpop.eup %996  ;;  %v445_v28 = vsel %vm388_vm9, %v995_v23, 0.0 }
 0x2f0   :  { %v447_v30 = vsel %vm388_vm9, %v997_v26, 0.0 }
 0x2f1   :  { %v442_v24 = vadd.f32 %v441_v22, %v440_v21 }
 0x2f3   :  { %v444_v27 = vadd.f32 %v443_v25, %v442_v24 }
 0x2f5   :  { %v446_v29 = vadd.f32 %v445_v28, %v444_v27 }
 0x2f7   :  { %v448_v31 = vadd.f32 %v447_v30, %v446_v29 }
 0x2f9   :  { %v449_v32 = vrot.slane %v448_v31, 4 }
 0x2fb   :  { %v450_v33 = vadd.f32 %v449_v32, %v448_v31 }
 0x2fd   :  { %v451_v34 = vrot.slane %v450_v33, 2 }
 0x2ff   :  { %v452_v35 = vadd.f32 %v451_v34, %v450_v33 }
 0x301   :  { %v453_v36 = vrot.slane %v452_v35, 1 }
 0x303   :  { %v454_v37 = vadd.f32 %v453_v36, %v452_v35 }
 0x305   :  { %998 = vrcp.f32 %v454_v37 }
 0x312   :  { %v999_v38 = vpop.eup %998 }
 0x313   :  { %v456_v39 = vmul.f32 %v999_v38, %v983_v9  ;;  %v457_v40 = vmul.f32 %v999_v38, %v985_v10  ;;  %v458_v41 = vmul.f32 %v999_v38, %v987_v12  ;;  %v459_v42 = vmul.f32 %v999_v38, %v989_v14 }
 0x314   :  { %v460_v43 = vmul.f32 %v999_v38, %v991_v17  ;;  %v461_v44 = vmul.f32 %v999_v38, %v993_v20  ;;  %v462_v45 = vmul.f32 %v999_v38, %v995_v23  ;;  %v463_v46 = vmul.f32 %v999_v38, %v997_v26 }
 0x315   :  { %947 = vmatprep.mubr.msk.f32.mxu0 %vm388_vm9, %v456_v39 }
 0x316   :  { %948 = vmatmul.mubr.msk.f32.vlgmr.msra.gmra.mxu0 %vm388_vm9, %v457_v40 }
 0x317   :  { %950 = vmatprep.mubr.msk.f32.mxu0 %vm388_vm9, %v458_v41 }
 0x31a   :  { %951 = vmatmul.mubr.msk.f32.gmra.mxu0 %vm388_vm9, %v459_v42 }
 0x31b   :  { %953 = vmatprep.mubr.msk.f32.mxu0 %vm388_vm9, %v460_v43 }
 0x31e   :  { %954 = vmatmul.mubr.msk.f32.gmra.mxu0 %vm388_vm9, %v461_v44 }
 0x31f   :  { %956 = vmatprep.mubr.msk.f32.mxu0 %vm388_vm9, %v462_v45 }
 0x322   :  { %957 = vmatmul.mubr.msk.f32.gmra.mxu0 %vm388_vm9, %v463_v46 }
 0x3d6   :  { %v949_v51 = vpop.f32.mrf.mxu0 }
 0x3d8   :  { %v578_v52 = vpop.f32.mrf.mxu0 }
 0x3da   :  { %v952_v53 = vpop.f32.mrf.mxu0 }
 0x3db   :  { %621 = vrot.lane.b32.xlu1 %v952_v53, %s1046_s13 }
 0x3dc   :  { %v588_v54 = vpop.f32.mrf.mxu0 }
 0x3dd   :  { %619 = vrot.lane.b32.xlu0 %v588_v54, %s1046_s13 }
 0x3de   :  { %v955_v55 = vpop.f32.mrf.mxu0 }
 0x3df   :  { %629 = vrot.lane.b32.xlu1 %v955_v55, %s1051_s4 }
 0x3e0   :  { %v598_v56 = vpop.f32.mrf.mxu0 }
 0x3e1   :  { %627 = vrot.lane.b32.xlu0 %v598_v56, %s1051_s4 }
 0x3e2   :  { %v958_v57 = vpop.f32.mrf.mxu0 }
 0x3e3   :  { %637 = vrot.lane.b32.xlu1 %v958_v57, %s1052_s5 }
 0x3e4   :  { %v608_v58 = vpop.f32.mrf.mxu0 }
 0x3e5   :  { %635 = vrot.lane.b32.xlu0 %v608_v58, %s1052_s5 }
 0x44d   :  { %v622_v59 = vpop.permute.xlu1 %621 }
 0x44e   :  { %v642_v1 = vsel %vm250_vm8, %v949_v51, %v622_v59 }
 0x44f   :  { %v620_v60 = vpop.permute.xlu0 %619 }
 0x450   :  { %v641_v63 = vsel %vm250_vm8, %v578_v52, %v620_v60 }
 0x451   :  { %v630_v61 = vpop.permute.xlu1 %629 }
 0x452   :  { %v645_v4 = vsel %vm643_vm10, %v642_v1, %v630_v61 }
 0x453   :  { %v628_v62 = vpop.permute.xlu0 %627 }
 0x454   :  { %v644_v2 = vsel %vm643_vm10, %v641_v63, %v628_v62 }
 0x455   :  { %v638_v0 = vpop.permute.xlu1 %637 }
 0x456   :  { %v648_v6 = vsel %vm646_vm11, %v645_v4, %v638_v0 }
 0x457   :  { %v636_v3 = vpop.permute.xlu0 %635 }
 0x458   :  { %v647_v5 = vsel %vm646_vm11, %v644_v2, %v636_v3 }
 0x459   :  { %967 = vmatprep.mubr.msk.f32.mxu1 %vm653_vm12, %v647_v5 }
 0x45a   :  { %968 = vmatmul.mubr.msk.f32.vlgmr.msra.gmra.mxu1 %vm653_vm12, %v648_v6 }
 0x51a   :  { %v969_v8 = vpop.f32.mrf.mxu1 }
 0x51b   :  { %v732_v9 = vadd.f32 %v969_v8, %v794_v7 }
 0x51c   :  { %v726_v10 = vpop.f32.mrf.mxu1 }
 0x51d   :  { %736 = vst [vmem:[#allocation5 + $0x8] sm:$0xff] %v732_v9  ;;  %v727_v11 = vadd.f32 %v794_v7, %v726_v10 }
 0x51f   :  { %735 = vst [vmem:[#allocation5] sm:$0xff] %v727_v11 }
 0x520   :  { %1031 = shalt.err (!%p1028_p9)
}
 0x521   :  { %748 = dma.vmem_to_hbm [thread:$0]  %s743_s7, 256, %s1189_s2, [#allocation4], %s1045_s12, %s1045_s12, %s1046_s13  }
 0x522   :  { %1042 = dma.done.wait [#allocation4], 256  }
 0x523   :  { %1043 = vsyncadd [#allocation4], 4294967040 }
 0x524   :  { %752 = vsyncpa [#allocation3], 1 }
 0x525   :  { %753 = vsyncpa [#allocation4], 1 }

</bundles_post_ra>
